<compile_context>
chip_gen: v7x
topology: tpu7x:2x2x1
jax: 0.10.0
libtpu: 0.0.40
codegen_flags: <defaults>
</compile_context>

<pallas_src>
import functools

import jax
import jax.numpy as jnp
from jax.experimental import pallas as pl
from jax.experimental.pallas import tpu as pltpu


def _cdiv(a, b):
    return -(-a // b)


def _tile_bytes(rows, lanes, itemsize):
    # VMEM footprint of a (rows, lanes) tile after (8, 128) layout padding.
    return _cdiv(rows, 8) * 8 * _cdiv(lanes, 128) * 128 * itemsize


def _lambda_shortcut_kernel(x_ref, sel_ref, o_ref, *, nb, rows_in, rows_out,
                            pad_rows):
    """One batch-block (NB images) per grid step.

    x_ref  : (NB*C_in*R , 2*G*W )   row = (image, channel, H-group); each row
                                    holds G consecutive (even, odd) H-row pairs.
    sel_ref: (2*G*W, G*W_out)       0/1 block-diagonal pick of (h even, w even).
    o_ref  : (NB*C_out*R, G*W_out)  channel-padded output, lane-dense.
    """
    x = x_ref[...]
    sel = sel_ref[...]

    if x.dtype == jnp.float32:
        # Exact f32 copy through the MXU: x == hi + mid + lo with each term
        # exactly representable in bf16; sel entries (0/1) are exact in bf16,
        # so three default-precision passes reconstruct x bit-exactly.
        hi = x.astype(jnp.bfloat16)
        r1 = x - hi.astype(jnp.float32)
        mid = r1.astype(jnp.bfloat16)
        lo = (r1 - mid.astype(jnp.float32)).astype(jnp.bfloat16)
        y = (jnp.dot(hi, sel, preferred_element_type=jnp.float32)
             + jnp.dot(mid, sel, preferred_element_type=jnp.float32)
             + jnp.dot(lo, sel, preferred_element_type=jnp.float32))
    else:
        # bf16 inputs: a single default-precision matmul is already exact.
        y = jnp.dot(x, sel, preferred_element_type=jnp.float32)
    y = y.astype(o_ref.dtype)

    # Zero band value hoisted once per block; the pad bands of different
    # images interleave in the row-flattened layout, so stores are per-image.
    zeros = (jnp.zeros((pad_rows, o_ref.shape[-1]), o_ref.dtype)
             if pad_rows else None)
    for b in range(nb):  # nb is a small static constant (<= 16)
        base = b * rows_out
        if pad_rows:
            o_ref[pl.ds(base, pad_rows), :] = zeros
            o_ref[pl.ds(base + pad_rows + rows_in, pad_rows), :] = zeros
        o_ref[pl.ds(base + pad_rows, rows_in), :] = \
            y[b * rows_in:(b + 1) * rows_in, :]


def _pick_group(h_half, w_out, target_lanes=128):
    """How many output rows (H_out) to group onto the lane axis.

    Larger G -> lane-denser matmul output and stores, but MXU work grows
    linearly with G (block-diagonal selection), so stop near 128 lanes.
    """
    g = max(1, min(h_half, _cdiv(target_lanes, w_out)))
    while h_half % g:
        g -= 1
    return g


def _make_selection_matrix(W, G, dtype):
    """S[p*W + w, (p//2)*W_out + w//2] = 1 for even p (< 2G) and even w (< W)."""
    W_out = W // 2
    gg, jj = jnp.meshgrid(jnp.arange(G), jnp.arange(W_out), indexing="ij")
    rows = (2 * gg * W + 2 * jj).reshape(-1)   # even H row of the pair, even W
    cols = (gg * W_out + jj).reshape(-1)
    sel = jnp.zeros((2 * G * W, G * W_out), dtype)
    return sel.at[rows, cols].set(jnp.asarray(1, dtype))


def _pick_batch_block(N, rows_in_pi, rows_out_pi, in_lanes, out_lanes, itemsize,
                      tile_budget_bytes, min_steps=8, max_unroll=16):
    """Largest NB that divides N, respects (8,128) row alignment, fits the
    double-buffered VMEM budget, and keeps >= min_steps grid steps when N allows."""
    def ok(nb):
        if N % nb:
            return False
        aligned = (((nb * rows_in_pi) % 8 == 0 or nb == N)
                   and ((nb * rows_out_pi) % 8 == 0 or nb == N))
        fits = 2 * (_tile_bytes(nb * rows_in_pi, in_lanes, itemsize)
                    + _tile_bytes(nb * rows_out_pi, out_lanes, itemsize)) \
            <= tile_budget_bytes
        return aligned and fits

    cap = min(N, max_unroll)
    if N >= min_steps:
        cap = min(cap, N // min_steps)   # keep pipeline depth for both TCs (v7x)
    for nb in range(max(cap, 1), 0, -1):
        if ok(nb):
            return nb
    for nb in range(1, N + 1):           # fallback: smallest legal divisor
        if ok(nb):
            return nb
    return N                              # full-array block is always layout-legal


def lambda_layer(x, planes):
    """Pallas implementation of the resnet20 option-A shortcut LambdaLayer."""
    N, C_in, H, W = x.shape
    assert H % 2 == 0 and W % 2 == 0, "resnet20 shortcut expects even H, W"
    assert x.dtype in (jnp.float32, jnp.bfloat16), "supported dtypes: f32, bf16"
    Hh, W_out = H // 2, W // 2
    pad = planes // 4
    C_out = C_in + 2 * pad

    G = _pick_group(Hh, W_out)   # H-row pairs per matmul row
    R = Hh // G                  # rows per channel per image in the 2-D view
    K = 2 * G * W                # contraction width
    L = G * W_out                # output lane width

    rows_in_pi = C_in * R
    rows_out_pi = C_out * R
    pad_rows = pad * R
    itemsize = jnp.dtype(x.dtype).itemsize

    # Free contiguous reshapes (pure layout plumbing, no data movement).
    x2d = x.reshape(N * rows_in_pi, K)
    sel = _make_selection_matrix(W, G, jnp.bfloat16)

    NB = _pick_batch_block(N, rows_in_pi, rows_out_pi, K, L, itemsize,
                           tile_budget_bytes=20 * 1024 * 1024)
    grid = (N // NB,)

    kernel = functools.partial(_lambda_shortcut_kernel, nb=NB,
                               rows_in=rows_in_pi, rows_out=rows_out_pi,
                               pad_rows=pad_rows)

    n_passes = 3 if x.dtype == jnp.float32 else 1
    cost = pl.CostEstimate(
        flops=2 * n_passes * N * rows_in_pi * K * L,
        transcendentals=0,
        bytes_accessed=(N * rows_in_pi * K + N * rows_out_pi * L) * itemsize
        + K * L * 2,
    )

    out2d = pl.pallas_call(
        kernel,
        out_shape=jax.ShapeDtypeStruct((N * rows_out_pi, L), x.dtype),
        grid_spec=pltpu.PrefetchScalarGridSpec(
            num_scalar_prefetch=0,
            grid=grid,
            in_specs=[
                pl.BlockSpec((NB * rows_in_pi, K), lambda n: (n, 0)),
                # Constant index_map -> selection matrix stays resident in VMEM.
                pl.BlockSpec((K, L), lambda n: (0, 0)),
            ],
            out_specs=pl.BlockSpec((NB * rows_out_pi, L), lambda n: (n, 0)),
        ),
        compiler_params=pltpu.CompilerParams(
            dimension_semantics=("parallel",),
            vmem_limit_bytes=32 * 1024 * 1024,
        ),
        cost_estimate=cost,
    )(x2d, sel)

    # Free contiguous reshape back to NCHW.
    return out2d.reshape(N, C_out, Hh, W_out)


if __name__ == "__main__":
    # Small shapes consistent with the module's use in resnet20:
    # batch=2, in-channels=4, spatial=16x16, planes=8 -> pad=2, out channels=8.
    key = jax.random.PRNGKey(0)
    x = jax.random.normal(key, (2, 4, 16, 16), dtype=jnp.float32)
    planes = 8

    y = jax.block_until_ready(lambda_layer(x, planes))

    # Pure-JAX reference of the PyTorch lambda.
    pad = planes // 4
    ref = jnp.pad(x[:, :, ::2, ::2], ((0, 0), (pad, pad), (0, 0), (0, 0)))
    assert y.shape == ref.shape, (y.shape, ref.shape)
    assert jnp.allclose(y, ref, atol=1e-6), float(jnp.abs(y - ref).max())

    # Second small shape exercising the grouped (R > 1, G < Hh) path that the
    # real 32x32 resnet stage uses.
    x2 = jax.random.normal(jax.random.PRNGKey(1), (2, 4, 32, 32),
                           dtype=jnp.float32)
    y2 = jax.block_until_ready(lambda_layer(x2, planes))
    ref2 = jnp.pad(x2[:, :, ::2, ::2], ((0, 0), (pad, pad), (0, 0), (0, 0)))
    assert y2.shape == ref2.shape, (y2.shape, ref2.shape)
    assert jnp.allclose(y2, ref2, atol=1e-6), float(jnp.abs(y2 - ref2).max())

    print("KERNEL_OK")
</pallas_src>

<mosaic_0001>
module attributes {stable_mosaic.version = 11 : i64} {
  func.func @_lambda_shortcut_kernel(%arg0: i32, %arg1: memref<8x256xf32, #tpu.memory_space<vmem>>, %arg2: memref<256x64xbf16, #tpu.memory_space<vmem>>, %arg3: memref<16x64xf32, #tpu.memory_space<vmem>>) attributes {dimension_semantics = [#tpu.dimension_semantics<parallel>], iteration_bounds = array<i64: 1>, scalar_prefetch = 0 : i64, scratch_operands = 0 : i64, tpu.core_type = #tpu.core_type<tc>, window_params = [{transform_indices = @transform_0, window_bounds = array<i64: 8, 256>}, {pipeline_mode = #tpu.pipeline_mode<synchronous>, transform_indices = @transform_1, window_bounds = array<i64: 256, 64>}, {transform_indices = @transform_2, window_bounds = array<i64: 16, 64>}]} {
    %c0 = arith.constant 0 : index
    %c0_0 = arith.constant 0 : index
    %0 = vector.load %arg1[%c0, %c0_0] : memref<8x256xf32, #tpu.memory_space<vmem>>, vector<8x256xf32>
    %c0_1 = arith.constant 0 : index
    %c0_2 = arith.constant 0 : index
    %1 = vector.load %arg2[%c0_1, %c0_2] : memref<256x64xbf16, #tpu.memory_space<vmem>>, vector<256x64xbf16>
    %2 = arith.truncf %0 : vector<8x256xf32> to vector<8x256xbf16>
    %3 = arith.extf %2 : vector<8x256xbf16> to vector<8x256xf32>
    %4 = arith.subf %0, %3 : vector<8x256xf32>
    %5 = arith.truncf %4 : vector<8x256xf32> to vector<8x256xbf16>
    %6 = arith.extf %5 : vector<8x256xbf16> to vector<8x256xf32>
    %7 = arith.subf %4, %6 : vector<8x256xf32>
    %8 = arith.truncf %7 : vector<8x256xf32> to vector<8x256xbf16>
    %cst = arith.constant dense<0.000000e+00> : vector<8x64xf32>
    %9 = tpu.matmul %2, %1, %cst {dimension_numbers = #tpu.dot_dimension_numbers<[1], [0], [0], [1], [0, 0, 1, 1], [], []>} : vector<8x256xbf16>, vector<256x64xbf16>, vector<8x64xf32> -> vector<8x64xf32>
    %cst_3 = arith.constant dense<0.000000e+00> : vector<8x64xf32>
    %10 = tpu.matmul %5, %1, %cst_3 {dimension_numbers = #tpu.dot_dimension_numbers<[1], [0], [0], [1], [0, 0, 1, 1], [], []>} : vector<8x256xbf16>, vector<256x64xbf16>, vector<8x64xf32> -> vector<8x64xf32>
    %11 = arith.addf %9, %10 : vector<8x64xf32>
    %cst_4 = arith.constant dense<0.000000e+00> : vector<8x64xf32>
    %12 = tpu.matmul %8, %1, %cst_4 {dimension_numbers = #tpu.dot_dimension_numbers<[1], [0], [0], [1], [0, 0, 1, 1], [], []>} : vector<8x256xbf16>, vector<256x64xbf16>, vector<8x64xf32> -> vector<8x64xf32>
    %13 = arith.addf %11, %12 : vector<8x64xf32>
    %cst_5 = arith.constant 0.000000e+00 : f32
    %14 = vector.broadcast %cst_5 : f32 to vector<2x64xf32>
    %c0_6 = arith.constant 0 : index
    %c0_7 = arith.constant 0 : index
    %15 = vector.load %arg3[%c0_6, %c0_7] : memref<16x64xf32, #tpu.memory_space<vmem>>, vector<2x64xf32>
    tpu.vector_store %arg3[%c0_6, %c0_7], %14 {strides = array<i32>} : memref<16x64xf32, #tpu.memory_space<vmem>>, vector<2x64xf32>,
    %c6 = arith.constant 6 : index
    %c0_8 = arith.constant 0 : index
    %16 = vector.load %arg3[%c6, %c0_8] : memref<16x64xf32, #tpu.memory_space<vmem>>, vector<2x64xf32>
    tpu.vector_store %arg3[%c6, %c0_8], %14 {strides = array<i32>} : memref<16x64xf32, #tpu.memory_space<vmem>>, vector<2x64xf32>,
    %17 = vector.extract_strided_slice %13 {offsets = [0, 0], sizes = [4, 64], strides = [1, 1]} : vector<8x64xf32> to vector<4x64xf32>
    %c2 = arith.constant 2 : index
    %c0_9 = arith.constant 0 : index
    %18 = vector.load %arg3[%c2, %c0_9] : memref<16x64xf32, #tpu.memory_space<vmem>>, vector<4x64xf32>
    tpu.vector_store %arg3[%c2, %c0_9], %17 {strides = array<i32>} : memref<16x64xf32, #tpu.memory_space<vmem>>, vector<4x64xf32>,
    %c8 = arith.constant 8 : index
    %c0_10 = arith.constant 0 : index
    %19 = vector.load %arg3[%c8, %c0_10] : memref<16x64xf32, #tpu.memory_space<vmem>>, vector<2x64xf32>
    tpu.vector_store %arg3[%c8, %c0_10], %14 {strides = array<i32>} : memref<16x64xf32, #tpu.memory_space<vmem>>, vector<2x64xf32>,
    %c14 = arith.constant 14 : index
    %c0_11 = arith.constant 0 : index
    %20 = vector.load %arg3[%c14, %c0_11] : memref<16x64xf32, #tpu.memory_space<vmem>>, vector<2x64xf32>
    tpu.vector_store %arg3[%c14, %c0_11], %14 {strides = array<i32>} : memref<16x64xf32, #tpu.memory_space<vmem>>, vector<2x64xf32>,
    %21 = vector.extract_strided_slice %13 {offsets = [4, 0], sizes = [4, 64], strides = [1, 1]} : vector<8x64xf32> to vector<4x64xf32>
    %c10 = arith.constant 10 : index
    %c0_12 = arith.constant 0 : index
    %22 = vector.load %arg3[%c10, %c0_12] : memref<16x64xf32, #tpu.memory_space<vmem>>, vector<4x64xf32>
    tpu.vector_store %arg3[%c10, %c0_12], %21 {strides = array<i32>} : memref<16x64xf32, #tpu.memory_space<vmem>>, vector<4x64xf32>,
    return
  }
  func.func @transform_0(%arg0: i32) -> (i32, i32) {
    %c0_i32 = arith.constant 0 : i32
    %c0_i32_0 = arith.constant 0 : i32
    return %arg0, %c0_i32 : i32, i32
  }
  func.func @transform_1(%arg0: i32) -> (i32, i32) {
    %c0_i32 = arith.constant 0 : i32
    %c0_i32_0 = arith.constant 0 : i32
    %c0_i32_1 = arith.constant 0 : i32
    return %c0_i32, %c0_i32_0 : i32, i32
  }
  func.func @transform_2(%arg0: i32) -> (i32, i32) {
    %c0_i32 = arith.constant 0 : i32
    %c0_i32_0 = arith.constant 0 : i32
    return %arg0, %c0_i32 : i32, i32
  }
}

</mosaic_0001>

<bundles_post_ra>
// kernel: tpu_custom_call.1
= control target key start
LH: loop header
LB: loop body
LE: loop exit
PB: predicated region body
PF: predicated region fallthrough
CT: control target
= control target key end

     0   :  { %s529_s0 = inlined_call_operand.vmem [shape: f32[8,256], index: 0, kind: input, shape index: {}]   ;;  %s530_s1 = inlined_call_operand.vmem [shape: bf16[256,64], index: 1, kind: input, shape index: {}]   ;;  %s531_s2 = inlined_call_operand.hbm [shape: f32[16,64], index: 2, kind: output, shape index: {}]  }
   0x1   :  { %v451_v0 = vld [vmem:[%s530_s1 + $0x40] sm:$0xff]   ;;  %v463_v2 = vld [vmem:[%s530_s1 + $0x48] sm:$0xff]   ;;  %v393_v4 = vld [vmem:[%s530_s1 + $0x50] sm:$0xff]  }
   0x2   :  { %v456_v1 = vld [vmem:[%s530_s1] sm:$0xff]   ;;  %319 = vmatprep.subr.bf16.mxu0 %v451_v0  ;;  %341 = vmatprep.subr.bf16.mxu1 %v451_v0  ;;  %v392_v3 = vld [vmem:[%s530_s1 + $0x8] sm:$0xff]   ;;  %v394_v5 = vld [vmem:[%s530_s1 + $0x10] sm:$0xff]  }
   0x3   :  { %320 = vmatpush3.bf16.msra.mxu0 %v456_v1  ;;  %342 = vmatpush3.bf16.msra.mxu1 %v456_v1  ;;  %v395_v6 = vld [vmem:[%s530_s1 + $0x58] sm:$0xff]   ;;  %v397_v8 = vld [vmem:[%s530_s1 + $0x60] sm:$0xff]   ;;  %v399_v10 = vld [vmem:[%s530_s1 + $0x68] sm:$0xff]  }
   0x4   :  { %321 = vmatprep.subr.bf16.mxu0 %v463_v2  ;;  %343 = vmatprep.subr.bf16.mxu1 %v463_v2  ;;  %v396_v7 = vld [vmem:[%s530_s1 + $0x18] sm:$0xff]   ;;  %v398_v9 = vld [vmem:[%s530_s1 + $0x20] sm:$0xff]   ;;  %v14_v11 = vld [vmem:[%s529_s0 + $0x8] sm:$0xff] }
   0x5   :  { %v13_v12 = vld [vmem:[%s529_s0] sm:$0xff] }
   0x7   :  { %322 = vmatpush3.bf16.msra.mxu0 %v392_v3  ;;  %344 = vmatpush3.bf16.msra.mxu1 %v392_v3 }
   0x8   :  { %323 = vmatprep.subr.bf16.mxu0 %v393_v4  ;;  %345 = vmatprep.subr.bf16.mxu1 %v393_v4 }
   0xb   :  { %324 = vmatpush3.bf16.msra.mxu0 %v394_v5  ;;  %346 = vmatpush3.bf16.msra.mxu1 %v394_v5 }
   0xc   :  { %325 = vmatprep.subr.bf16.mxu0 %v395_v6  ;;  %347 = vmatprep.subr.bf16.mxu1 %v395_v6 }
   0xf   :  { %326 = vmatpush3.bf16.msra.mxu0 %v396_v7  ;;  %348 = vmatpush3.bf16.msra.mxu1 %v396_v7 }
  0x10   :  { %327 = vmatprep.subr.bf16.mxu0 %v397_v8  ;;  %349 = vmatprep.subr.bf16.mxu1 %v397_v8 }
  0x11   :  { %7 = vsyncpa [#allocation3], 0  ;;  %v48_v13 = vpack.c.bf16 %v14_v11, %v14_v11  ;;  %v47_v14 = vpack.c.bf16 %v13_v12, %v13_v12  ;;  %v400_v15 = vld [vmem:[%s530_s1 + $0x28] sm:$0xff]   ;;  %v401_v17 = vld [vmem:[%s530_s1 + $0x70] sm:$0xff]   ;;  %vm278_vm0 = vcmask 517120   ;;  %v429_v32 = vmov 0.0  }
  0x12   :  { %v402_v20 = vld [vmem:[%s530_s1 + $0x30] sm:$0xff]   ;;  %v403_v22 = vld [vmem:[%s530_s1 + $0x78] sm:$0xff]   ;;  %279 = vst.msk [vmem:[#allocation2] sm:$0x3] %vm278_vm0, %v429_v32  ;;  %280 = vst.msk [vmem:[#allocation2 + $0x6] sm:$0x3] %vm278_vm0, %v429_v32 }
  0x13   :  { %328 = vmatpush3.bf16.msra.mxu0 %v398_v9  ;;  %350 = vmatpush3.bf16.msra.mxu1 %v398_v9  ;;  %v50_v16 = vunpack.c.l.bf16 %v48_v13  ;;  %v49_v19 = vunpack.c.l.bf16 %v47_v14  ;;  %v404_v25 = vld [vmem:[%s530_s1 + $0x38] sm:$0xff]   ;;  %283 = vst.msk [vmem:[#allocation2 + $0x8] sm:$0x3] %vm278_vm0, %v429_v32  ;;  %284 = vst.msk [vmem:[#allocation2 + $0xe] sm:$0x3] %vm278_vm0, %v429_v32  ;;  %s430_s1 = smov [#allocation2]  }
  0x14   :  { %329 = vmatprep.subr.bf16.mxu0 %v399_v10  ;;  %351 = vmatprep.subr.bf16.mxu1 %v399_v10  ;;  %s292_s16 = sshll.u32 %s430_s1, 4  ;;  %vm281_vm1 = vcmask 519168   ;;  %vm285_vm2 = vcmask 523268   ;;  %s293_s16 = int_to_ptr.vmem [resolvable:$true] %s292_s16 }
  0x15   :  { %v52_v18 = vsub.f32 %v14_v11, %v50_v16  ;;  %229 = vmatprep.mubr.bf16.mxu1 %v48_v13  ;;  %v51_v24 = vsub.f32 %v13_v12, %v49_v19  ;;  %s405_s17 = scalar_lea.vmem %s293_s16, 256  ;;  %p410_p1 = scmp.lt.s32.totalorder %s293_s16, %s293_s16 }
  0x16   :  { %p406_p0 = scmp.ne.s32.totalorder %s293_s16, %s405_s17  ;;  %p411_p2 = scmp.lt.s32.totalorder %s405_s17, %s405_s17 }
  0x17   :  { %330 = vmatpush3.bf16.msra.mxu0 %v400_v15  ;;  %352 = vmatpush3.bf16.msra.mxu1 %v400_v15  ;;  %v54_v21 = vpack.c.bf16 %v52_v18, %v52_v18  ;;  %v53_v27 = vpack.c.bf16 %v51_v24, %v51_v24 }
  0x18   :  { %331 = vmatprep.subr.bf16.mxu0 %v401_v17  ;;  %353 = vmatprep.subr.bf16.mxu1 %v401_v17  ;;  %p412_p3 = por %p411_p2, %p410_p1 }
  0x19   :  { %v56_v23 = vunpack.c.l.bf16 %v54_v21  ;;  %189 = vmatprep.mubr.bf16.mxu0 %v54_v21  ;;  %v55_v29 = vunpack.c.l.bf16 %v53_v27 }
  0x1a   :  { %p413_p4 = pnand %p412_p3, %p406_p0 }
  0x1b   :  { %332 = vmatpush3.bf16.msra.mxu0 %v402_v20  ;;  %354 = vmatpush3.bf16.msra.mxu1 %v402_v20  ;;  %v58_v26 = vsub.f32 %v52_v18, %v56_v23  ;;  %v57_v30 = vsub.f32 %v51_v24, %v55_v29 }
  0x1c   :  { %333 = vmatprep.subr.bf16.mxu0 %v403_v22  ;;  %355 = vmatprep.subr.bf16.mxu1 %v403_v22 }
  0x1d   :  { %v60_v28 = vpack.c.bf16 %v58_v26, %v58_v26  ;;  %v59_v31 = vpack.c.bf16 %v57_v30, %v57_v30 }
  0x1f   :  { %334 = vmatpush3.bf16.msra.mxu0 %v404_v25  ;;  %356 = vmatpush3.bf16.msra.mxu1 %v404_v25 }
  0x20   :  { %363 = vmatprep.subr.bf16.mxu0 %v451_v0 }
  0x22   :  { %190 = vmatmul.mubr.bf16.vlgmr.msra.gmra.mrb[0].mxu0 %v53_v27  ;;  %230 = vmatmul.mubr.bf16.vlgmr.msra.gmra.mrb[0].mxu1 %v47_v14 }
  0x23   :  { %364 = vmatpush3.bf16.msra.mxu0 %v456_v1  ;;  %269 = vmatprep.mubr.bf16.mxu0 %v60_v28 }
  0x24   :  { %365 = vmatprep.subr.bf16.mxu0 %v463_v2 }
  0x27   :  { %366 = vmatpush3.bf16.msra.mxu0 %v392_v3 }
  0x28   :  { %367 = vmatprep.subr.bf16.mxu0 %v393_v4 }
  0x2b   :  { %368 = vmatpush3.bf16.msra.mxu0 %v394_v5 }
  0x2c   :  { %369 = vmatprep.subr.bf16.mxu0 %v395_v6 }
  0x2f   :  { %370 = vmatpush3.bf16.msra.mxu0 %v396_v7 }
  0x30   :  { %371 = vmatprep.subr.bf16.mxu0 %v397_v8 }
  0x33   :  { %372 = vmatpush3.bf16.msra.mxu0 %v398_v9 }
  0x34   :  { %373 = vmatprep.subr.bf16.mxu0 %v399_v10 }
  0x37   :  { %374 = vmatpush3.bf16.msra.mxu0 %v400_v15 }
  0x38   :  { %375 = vmatprep.subr.bf16.mxu0 %v401_v17 }
  0x3b   :  { %376 = vmatpush3.bf16.msra.mxu0 %v402_v20 }
  0x3c   :  { %377 = vmatprep.subr.bf16.mxu0 %v403_v22 }
  0x3f   :  { %378 = vmatpush3.bf16.msra.mxu0 %v404_v25 }
  0x42   :  { %270 = vmatmul.mubr.bf16.vlgmr.msra.gmra.mrb[4].mxu0 %v59_v31 }
  0xf5   :  { %v335_v33 = vpop.f32.mrb[0].mxu0  ;;  %v357_v34 = vpop.f32.mrb[0].mxu1 }
  0xf6   :  { %v336_v35 = vpop.f32.mrb[1].mxu0  ;;  %v358_v36 = vpop.f32.mrb[1].mxu1 }
  0xf7   :  { %v337_v37 = vadd.f32 %v336_v35, %v335_v33  ;;  %v359_v38 = vadd.f32 %v358_v36, %v357_v34  ;;  %v338_v39 = vpop.f32.mrb[2].mxu0  ;;  %v360_v40 = vpop.f32.mrb[2].mxu1 }
  0xf8   :  { %v339_v41 = vpop.f32.mrb[3].mxu0  ;;  %v361_v42 = vpop.f32.mrb[3].mxu1 }
  0xf9   :  { %v232_v43 = vadd.f32 %v359_v38, %v337_v37 }
 0x115   :  { %v379_v44 = vpop.f32.mrb[4].mxu0 }
 0x116   :  { %v380_v45 = vpop.f32.mrb[5].mxu0 }
 0x117   :  { %v381_v46 = vadd.f32 %v380_v45, %v379_v44  ;;  %v382_v47 = vpop.f32.mrb[6].mxu0 }
 0x118   :  { %v383_v48 = vpop.f32.mrb[7].mxu0 }
 0x119   :  { %v277_v49 = vadd.f32 %v381_v46, %v232_v43 }
 0x11b   :  { %282 = vst.msk [vmem:[#allocation2 + $0x2] sm:$0xf] %vm281_vm1, %v277_v49 }
 0x11c   :  { %286 = vst.msk [vmem:[#allocation2 + $0x6] sm:$0xf0] %vm285_vm2, %v277_v49 }
 0x11d   :  { %416 = shalt.err (!%p413_p4)
}
 0x11e   :  { %s417_s20 = scalar_lea.hbm %s531_s2, 256 }
 0x11f   :  { %p418_p5 = scmp.ne.s32.totalorder %s531_s2, %s417_s20  ;;  %p421_p6 = scmp.lt.u32.totalorder %s417_s20, %s531_s2 }
 0x121   :  { %p423_p7 = pnand %p421_p6, %p418_p5 }
 0x123   :  { %426 = shalt.err (!%p423_p7)
}
 0x124   :  { %s431_s25 = smov 128   ;;  %s432_s26 = smov 8  }
 0x125   :  { %298 = dma.vmem_to_hbm [thread:$0]  %s293_s16, 256, %s531_s2, [#allocation3], %s431_s25, %s431_s25, %s432_s26  }
 0x126   :  { %427 = dma.done.wait [#allocation3], 256  }
 0x127   :  { %428 = vsyncadd [#allocation3], 4294967040 }
 0x128   :  { %302 = vsyncpa [#allocation3], 1 }

</bundles_post_ra>
